<compile_context>
chip_gen: v6e
topology: v6e:2x2x1
jax: 0.10.0
libtpu: 0.0.40
codegen_flags: <defaults>
</compile_context>

<pallas_src>
import jax
import jax.numpy as jnp
from jax.experimental import pallas as pl
from jax.experimental.pallas import tpu as pltpu


def _round_up(x, m):
    return (x + m - 1) // m * m


def _normalize_kernel(x_ref, m_ref, s_ref, o_ref):
    # x: (tm, tn); m/s: (tm, 1) broadcast across the lane axis.  Matches the PyTorch
    # semantics tensor.sub(mean).div(std) in f32.
    o_ref[...] = (x_ref[...] - m_ref[...]) / s_ref[...]


def normalize_by_channel_mean_std(x_nchw, mean, std):
    """(x - mean[None, :, None, None]) / std[None, :, None, None] via Pallas."""
    x_nchw = jnp.asarray(x_nchw, jnp.float32)
    mean = jnp.asarray(mean, jnp.float32).reshape(-1)
    std = jnp.asarray(std, jnp.float32).reshape(-1)
    N, C, H, W = x_nchw.shape
    assert mean.shape == (C,) and std.shape == (C,), (mean.shape, std.shape, C)

    M, L = N * C, H * W
    x2 = x_nchw.reshape(M, L)
    # Per-row (i.e. per (n, c)) mean / std column vectors; tiny (N*C elements).
    m_rows = jnp.tile(mean, N).reshape(M, 1)
    s_rows = jnp.tile(std, N).reshape(M, 1)

    # Large lane-dense tiles: memory-bound op, amortize ~0.35us per grid step.
    # VMEM budget: (x + out) double-buffered at 256x2048xf32 = 8 MiB, well within the
    # 32 MiB scoped default on all generations (and v7x's 64 MiB physical ceiling).
    tm = min(_round_up(M, 8), 256)
    tn = min(_round_up(L, 128), 2048)
    Mp, Lp = _round_up(M, tm), _round_up(L, tn)

    x2p = jnp.pad(x2, ((0, Mp - M), (0, Lp - L)))
    m_p = jnp.pad(m_rows, ((0, Mp - M), (0, 0)))
    # Pad std rows with 1.0 so padded rows never divide by zero.
    s_p = jnp.pad(s_rows, ((0, Mp - M), (0, 0)), constant_values=1.0)

    grid = (Mp // tm, Lp // tn)
    out = pl.pallas_call(
        _normalize_kernel,
        out_shape=jax.ShapeDtypeStruct((Mp, Lp), jnp.float32),
        grid_spec=pltpu.PrefetchScalarGridSpec(
            num_scalar_prefetch=0,
            grid=grid,
            in_specs=[
                pl.BlockSpec((tm, tn), lambda i, j: (i, j)),
                pl.BlockSpec((tm, 1), lambda i, j: (i, 0)),
                pl.BlockSpec((tm, 1), lambda i, j: (i, 0)),
            ],
            out_specs=pl.BlockSpec((tm, tn), lambda i, j: (i, j)),
        ),
        compiler_params=pltpu.CompilerParams(
            dimension_semantics=("parallel", "parallel")),
    )(x2p, m_p, s_p)

    return out[:M, :L].reshape(N, C, H, W)


if __name__ == "__main__":
    key = jax.random.PRNGKey(0)
    # Small NCHW input consistent with the module: batch=2, channels=3, spatial=16.
    x = jax.random.normal(key, (2, 3, 16, 16), dtype=jnp.float32)
    mean = jnp.array([0.485, 0.456, 0.406], dtype=jnp.float32)
    std = jnp.array([0.229, 0.224, 0.225], dtype=jnp.float32)

    fwd = jax.jit(normalize_by_channel_mean_std)
    out = jax.block_until_ready(fwd(x, mean, std))

    ref = (x - mean[None, :, None, None]) / std[None, :, None, None]
    assert out.shape == x.shape, out.shape
    assert jnp.all(jnp.isfinite(out))
    assert jnp.allclose(out, ref, atol=1e-5, rtol=1e-5), float(jnp.max(jnp.abs(out - ref)))
    print("KERNEL_OK")
</pallas_src>

<mosaic_0001>
module attributes {stable_mosaic.version = 11 : i64} {
  func.func @_normalize_kernel(%arg0: i32, %arg1: i32, %arg2: memref<8x256xf32, #tpu.memory_space<vmem>>, %arg3: memref<8x1xf32, #tpu.memory_space<vmem>>, %arg4: memref<8x1xf32, #tpu.memory_space<vmem>>, %arg5: memref<8x256xf32, #tpu.memory_space<vmem>>) attributes {dimension_semantics = [#tpu.dimension_semantics<parallel>, #tpu.dimension_semantics<parallel>], iteration_bounds = array<i64: 1, 1>, scalar_prefetch = 0 : i64, scratch_operands = 0 : i64, tpu.core_type = #tpu.core_type<tc>, window_params = [{transform_indices = @transform_0, window_bounds = array<i64: 8, 256>}, {transform_indices = @transform_1, window_bounds = array<i64: 8, 1>}, {transform_indices = @transform_2, window_bounds = array<i64: 8, 1>}, {transform_indices = @transform_3, window_bounds = array<i64: 8, 256>}]} {
    %c0 = arith.constant 0 : index
    %c0_0 = arith.constant 0 : index
    %0 = vector.load %arg2[%c0, %c0_0] : memref<8x256xf32, #tpu.memory_space<vmem>>, vector<8x256xf32>
    %c0_1 = arith.constant 0 : index
    %c0_2 = arith.constant 0 : index
    %1 = vector.load %arg3[%c0_1, %c0_2] : memref<8x1xf32, #tpu.memory_space<vmem>>, vector<8x1xf32>
    %2 = vector.broadcast %1 : vector<8x1xf32> to vector<8x256xf32>
    %3 = arith.subf %0, %2 : vector<8x256xf32>
    %c0_3 = arith.constant 0 : index
    %c0_4 = arith.constant 0 : index
    %4 = vector.load %arg4[%c0_3, %c0_4] : memref<8x1xf32, #tpu.memory_space<vmem>>, vector<8x1xf32>
    %5 = vector.broadcast %4 : vector<8x1xf32> to vector<8x256xf32>
    %6 = arith.divf %3, %5 : vector<8x256xf32>
    %c0_5 = arith.constant 0 : index
    %c0_6 = arith.constant 0 : index
    %7 = vector.load %arg5[%c0_5, %c0_6] : memref<8x256xf32, #tpu.memory_space<vmem>>, vector<8x256xf32>
    tpu.vector_store %arg5[%c0_5, %c0_6], %6 {strides = array<i32>} : memref<8x256xf32, #tpu.memory_space<vmem>>, vector<8x256xf32>,
    return
  }
  func.func @transform_0(%arg0: i32, %arg1: i32) -> (i32, i32) {
    %c0_i32 = arith.constant 0 : i32
    return %arg0, %arg1 : i32, i32
  }
  func.func @transform_1(%arg0: i32, %arg1: i32) -> (i32, i32) {
    %c0_i32 = arith.constant 0 : i32
    %c0_i32_0 = arith.constant 0 : i32
    return %arg0, %c0_i32 : i32, i32
  }
  func.func @transform_2(%arg0: i32, %arg1: i32) -> (i32, i32) {
    %c0_i32 = arith.constant 0 : i32
    %c0_i32_0 = arith.constant 0 : i32
    return %arg0, %c0_i32 : i32, i32
  }
  func.func @transform_3(%arg0: i32, %arg1: i32) -> (i32, i32) {
    %c0_i32 = arith.constant 0 : i32
    return %arg0, %arg1 : i32, i32
  }
}

</mosaic_0001>

<bundles_post_ra>
// kernel: tile.1
= control target key start
LH: loop header
LB: loop body
LE: loop exit
PB: predicated region body
PF: predicated region fallthrough
CT: control target
= control target key end

     0   :  { %vm8_vm0 = vcmask 7168   ;;  %s27_s10 = smov 126   ;;  %s50_s0 = inlined_call_operand.vmem [shape: f32[2,3], index: 0, kind: input, shape index: {}]   ;;  %s51_s1 = inlined_call_operand.vmem [shape: f32[6,1], index: 1, kind: output, shape index: {}]  }
   0x1   :  { %v5_v0 = vld [vmem:[%s50_s0] sm:$0x3]  ;;  %s26_s0 = smov 127  }
   0x2   :  { %6 = vst [vmem:[#allocation0] sm:$0x3] %v5_v0 }
   0x9   :  { %v10_v1 = vld [vmem:[#allocation0] sm:$0x3]  }
   0xa   :  { %v7_v2 = vld [vmem:[#allocation0] sm:$0x3]   ;;  %11 = vrot.lane.b32.xlu0 %v10_v1, %s26_s0 }
   0xb   :  { %9 = vst.msk [vmem:[%s51_s1] ss:$3 sm:$0x3] %vm8_vm0, %v7_v2   ;;  %v16_v3 = vld [vmem:[#allocation0] sm:$0x3]  }
   0xe   :  { %17 = vrot.lane.b32.xlu0 %v16_v3, %s27_s10 }
  0x7c   :  { %v12_v4 = vpop.permute.xlu0 %11  }
  0x7d   :  { %22 = vst.msk [vmem:[%s51_s1 + $0x1] ss:$3 sm:$0x3] %vm8_vm0, %v12_v4  }
  0x80   :  { %v18_v5 = vpop.permute.xlu0 %17  }
  0x81   :  { %23 = vst.msk [vmem:[%s51_s1 + $0x2] ss:$3 sm:$0x3] %vm8_vm0, %v18_v5  }

// kernel: tile.13
= control target key start
LH: loop header
LB: loop body
LE: loop exit
PB: predicated region body
PF: predicated region fallthrough
CT: control target
= control target key end

     0   :  { %s22_s0 = inlined_call_operand.vmem [shape: f32[3], index: 0, kind: input, shape index: {}]   ;;  %s23_s1 = inlined_call_operand.vmem [shape: f32[2,3], index: 1, kind: output, shape index: {}]  }
   0x1   :  { %v4_v0 = vld [vmem:[%s22_s0] ss:$0 sm:$0xff] }
   0x2   :  { %5 = vst [vmem:[%s23_s1] sm:$0x3] %v4_v0 }

// kernel: normalize_by_channel_mean_std.1
= control target key start
LH: loop header
LB: loop body
LE: loop exit
PB: predicated region body
PF: predicated region fallthrough
CT: control target
= control target key end

     0   :  { %v43_v0 = vmov 0   ;;  %s82_s2 = inlined_call_operand.vmem [shape: f32[8,1], index: 2, kind: input, shape index: {}]   ;;  %s83_s1 = inlined_call_operand.vmem [shape: f32[8,1], index: 1, kind: input, shape index: {}]   ;;  %s84_s0 = inlined_call_operand.vmem [shape: f32[8,256], index: 0, kind: input, shape index: {}]   ;;  %s85_s3 = inlined_call_operand.vmem [shape: f32[8,256], index: 3, kind: output, shape index: {}]  }
   0x1   :  { %40 = vset.pattern.permute.xlu0 %v43_v0  ;;  %v24_v1 = vld [vmem:[%s82_s2] sm:$0xff]  ;;  %v15_v6 = vld [vmem:[%s84_s0 + $0x8] sm:$0xff] }
   0x2   :  { %27 = vperm.xlu0 %40, %v24_v1   ;;  %v16_v2 = vld [vmem:[%s83_s1] sm:$0xff] }
   0x3   :  { %v14_v5 = vld [vmem:[%s84_s0] sm:$0xff] }
   0x6   :  { %19 = vperm.xlu0 %40, %v16_v2  }
  0x7d   :  { %v28_v3 = vpop.permute.xlu0 %27 }
  0x7e   :  { %41 = vrcp.f32 %v28_v3 }
  0x81   :  { %v20_v4 = vpop.permute.xlu0 %19 }
  0x82   :  { %v22_v7 = vsub.f32 %v14_v5, %v20_v4  ;;  %v23_v8 = vsub.f32 %v15_v6, %v20_v4 }
  0x8b   :  { %v42_v9 = vpop.eup %41 }
  0x8c   :  { %v31_v10 = vmul.f32 %v42_v9, %v22_v7  ;;  %v32_v11 = vmul.f32 %v42_v9, %v23_v8 }
  0x8e   :  { %33 = vst [vmem:[%s85_s3] sm:$0xff] %v31_v10  ;;  %34 = vst [vmem:[%s85_s3 + $0x8] sm:$0xff] %v32_v11 }

</bundles_post_ra>
